<compile_context>
chip_gen: v5e
topology: v5e:2x2
jax: 0.10.0
libtpu: 0.0.40
codegen_flags: <defaults>
</compile_context>

<pallas_src>
import math

import jax
import jax.numpy as jnp
import numpy as np
from jax.experimental import pallas as pl
from jax.experimental.pallas import tpu as pltpu


def _sine_pos_kernel(yx_ref, expand_ref, tab_ref, out_ref):
    """One row-tile of the lane-dense (B, H, W*dim) output slab.

    yx_ref     : VMEM (1, TH, 2W)    [y | x] cumulative sums (f32, integer-valued)
    expand_ref : VMEM (2W, W*dim)    one-hot column->lane placement matrix (0/1)
    tab_ref    : VMEM (2, W*dim)     row 0: per-lane frequency (1/max folded in)
                                     row 1: per-lane phase (0 / pi/2 -> fused sin/cos)
    out_ref    : VMEM (1, TH, W*dim) lane-dense output slab
    """
    # One MXU matmul does all lane expansion/placement: for lane l = w*dim + c,
    # arg[:, l] = y[:, w] if c < dim//2 else x[:, w].  The matrix is one-hot and y/x
    # are small integers, so this contraction is exact even if operands are truncated.
    arg = jnp.dot(yx_ref[0], expand_ref[...], preferred_element_type=jnp.float32)
    # Full-width VPU mul+add, one EUP sin, one dense store per output vreg.
    # interleave(sin(p), cos(p)) == sin(p * freq + phase) with phase = [0, pi/2, ...].
    out_ref[0] = jnp.sin(arg * tab_ref[0:1, :] + tab_ref[1:2, :]).astype(out_ref.dtype)


def _vmem_capacity_bytes():
    try:
        return int(pltpu.get_tpu_info().vmem_capacity_bytes)
    except Exception:
        return 64 * 1024 * 1024   # v7x-sized conservative fallback


def _pick_tile_h(B, H, W, dim, out_itemsize, budget_bytes, min_grid_steps=4):
    """Largest row-tile that fits the VMEM budget while still exposing at least
    `min_grid_steps` parallel grid steps (so multi-TC parts like v7x get sharded work
    even when B == 1)."""
    wd = W * dim
    out_row = wd * out_itemsize * 2          # output rows, double-buffered
    in_row = 2 * W * 4 * 2                   # [y | x] f32 rows, double-buffered
    fixed = (2 * W * wd + 2 * wd) * 4 * 2    # expansion matrix + freq/phase table bufs
    avail = max(budget_bytes - fixed, 8 * (out_row + in_row))
    max_rows = max(8, avail // (out_row + in_row))
    tiles_wanted = max(1, -(-min_grid_steps // B))       # ceil(min_steps / B)
    cap = max(8, -(-H // tiles_wanted))                  # ceil(H / tiles_wanted)
    tile = int(min(H, max_rows, cap))
    if tile >= H:
        return H
    return max(8, (tile // 8) * 8)


def sine_positional_encoding(mask, dim=32, scale=2.0 * math.pi,
                             out_dtype=jnp.float32, tile_h=None):
    """Pallas implementation of SinePositionalEncoding.forward.

    out_dtype=jnp.bfloat16 halves the (dominant) output HBM traffic — recommended on
    v5e/v6e when downstream accepts it; default float32 matches the PyTorch module.
    """
    assert dim % 4 == 0, "dim must be divisible by 4 (dim//2 must be even)"
    B, H, W = mask.shape
    half, quarter = dim // 2, dim // 4
    wd = W * dim

    # ---- cheap O(B*H*W) glue: cumsums + GLOBAL maxima, exactly like the torch module
    # (y/y.max(), x/x.max(), no eps; an all-padded mask gives inf/nan just like torch).
    not_mask = 1 - mask.astype(jnp.int32)
    y = jnp.cumsum(not_mask, axis=1).astype(jnp.float32)   # cumsum over rows (dim 1)
    x = jnp.cumsum(not_mask, axis=2).astype(jnp.float32)   # cumsum over cols (dim 2)
    inv_y = 1.0 / jnp.max(y)
    inv_x = 1.0 / jnp.max(x)
    # TODO(synk): stream only not_mask and do the intra-tile x-cumsum in-kernel to shave
    # one input pass; inputs are dim/2x smaller than the output so the win is minor.
    yx = jnp.concatenate([y, x], axis=-1)                   # (B, H, 2W)

    # ---- per-lane tables over the dense (W*dim) slab: frequency (1/max folded in) and
    # phase ([0, pi/2, ...] turns interleave(sin, cos) into one fused sin). -----------
    logspace = (scale ** jnp.linspace(1.0, -4.0, quarter)).astype(jnp.float32)
    freq = jnp.repeat(logspace, 2)                                            # (half,)
    phase = jnp.tile(jnp.array([0.0, math.pi / 2.0], jnp.float32), quarter)   # (half,)
    freq_row = jnp.tile(jnp.concatenate([freq * inv_y, freq * inv_x]), W)     # (wd,)
    phase_row = jnp.tile(jnp.concatenate([phase, phase]), W)                  # (wd,)
    tables = jnp.stack([freq_row, phase_row])                                 # (2, wd)

    # ---- one-hot placement matrix for the in-kernel MXU expansion: lane l = w*dim + c
    # reads y column w (c < half) or x column w (c >= half). -------------------------
    lane = np.arange(wd)
    col, chan = lane // dim, lane % dim
    src = np.where(chan < half, col, W + col)
    expand_np = np.zeros((2 * W, wd), np.float32)
    expand_np[src, lane] = 1.0
    expand = jnp.asarray(expand_np)
    # TODO(synk): for very large W, block the (2W, W*dim) matrix over W-chunks (it grows
    # as W^2) and/or keep it bf16 instead of passing it whole.

    # ---- hot path: lane-dense slab, tiled over (batch, row-tiles) -------------------
    out_itemsize = jnp.dtype(out_dtype).itemsize
    vmem_cap = _vmem_capacity_bytes()
    if tile_h is None:
        tile_h = _pick_tile_h(B, H, W, dim, out_itemsize, budget_bytes=vmem_cap // 4)
    grid = (B, pl.cdiv(H, tile_h))

    out = pl.pallas_call(
        _sine_pos_kernel,
        out_shape=jax.ShapeDtypeStruct((B, H, wd), out_dtype),
        grid=grid,
        in_specs=[
            pl.BlockSpec((1, tile_h, 2 * W), lambda b, h: (b, h, 0)),  # [y | x] tile
            pl.BlockSpec((2 * W, wd), lambda b, h: (0, 0)),            # one-hot matrix
            pl.BlockSpec((2, wd), lambda b, h: (0, 0)),                # freq/phase rows
        ],
        out_specs=pl.BlockSpec((1, tile_h, wd), lambda b, h: (b, h, 0)),
        compiler_params=pltpu.CompilerParams(
            dimension_semantics=("parallel", "parallel"),
            vmem_limit_bytes=int(vmem_cap * 3 // 4)),
    )(yx, expand, tables)

    # Free reshape: (B, H, W*dim) and (B, H, W, dim) share the same contiguous layout.
    # Dense (unmasked) in-kernel stores need W*dim % 128 == 0 (i.e. W % 4 for dim=32);
    # other W still run correctly, the trailing vreg per row just becomes masked.
    return out.reshape(B, H, W, dim)


def _reference(mask, dim, scale):
    """Pure-JAX transcription of the PyTorch module, for correctness checking."""
    not_mask = 1 - mask.astype(jnp.int32)
    y = jnp.cumsum(not_mask, axis=1).astype(jnp.float32)
    x = jnp.cumsum(not_mask, axis=2).astype(jnp.float32)
    quarter = dim // 4
    logspace = (scale ** jnp.linspace(1.0, -4.0, quarter)).astype(jnp.float32)

    def sine_transform(off):
        p = off[..., None] * logspace                        # (..., dim//4)
        z = jnp.stack([jnp.sin(p), jnp.cos(p)], axis=-1)     # (..., dim//4, 2)
        return z.reshape(*off.shape, 2 * quarter)            # interleaved

    pos_y = sine_transform(y / jnp.max(y))
    pos_x = sine_transform(x / jnp.max(x))
    return jnp.concatenate([pos_y, pos_x], axis=-1)


if __name__ == "__main__":
    B, H, W, DIM = 2, 16, 16, 32
    key = jax.random.PRNGKey(0)
    # boolean padding mask (True = padded); ~20% padded so the maxima are > 0
    mask = jax.random.bernoulli(key, 0.2, (B, H, W))

    out = sine_positional_encoding(mask, dim=DIM)
    out = jax.block_until_ready(out)

    ref = _reference(mask, DIM, 2.0 * math.pi)
    assert out.shape == (B, H, W, DIM)
    assert np.allclose(np.asarray(out), np.asarray(ref), atol=1e-5, rtol=1e-5), (
        "mismatch vs reference"
    )
    print("KERNEL_OK")
</pallas_src>

<mosaic_0001>
module attributes {stable_mosaic.version = 11 : i64} {
  func.func @_sine_pos_kernel(%arg0: i32, %arg1: i32, %arg2: memref<1x8x32xf32, #tpu.memory_space<vmem>>, %arg3: memref<32x512xf32, #tpu.memory_space<vmem>>, %arg4: memref<2x512xf32, #tpu.memory_space<vmem>>, %arg5: memref<1x8x512xf32, #tpu.memory_space<vmem>>) attributes {dimension_semantics = [#tpu.dimension_semantics<parallel>, #tpu.dimension_semantics<parallel>], iteration_bounds = array<i64: 2, 2>, scalar_prefetch = 0 : i64, scratch_operands = 0 : i64, tpu.core_type = #tpu.core_type<tc>, window_params = [{transform_indices = @transform_0, window_bounds = array<i64: 1, 8, 32>}, {pipeline_mode = #tpu.pipeline_mode<synchronous>, transform_indices = @transform_1, window_bounds = array<i64: 32, 512>}, {pipeline_mode = #tpu.pipeline_mode<synchronous>, transform_indices = @transform_2, window_bounds = array<i64: 2, 512>}, {transform_indices = @transform_3, window_bounds = array<i64: 1, 8, 512>}]} {
    %c0 = arith.constant 0 : index
    %c0_0 = arith.constant 0 : index
    %c0_1 = arith.constant 0 : index
    %0 = vector.load %arg2[%c0, %c0_0, %c0_1] : memref<1x8x32xf32, #tpu.memory_space<vmem>>, vector<1x8x32xf32>
    %1 = vector.shape_cast %0 : vector<1x8x32xf32> to vector<8x32xf32>
    %c0_2 = arith.constant 0 : index
    %c0_3 = arith.constant 0 : index
    %2 = vector.load %arg3[%c0_2, %c0_3] : memref<32x512xf32, #tpu.memory_space<vmem>>, vector<32x512xf32>
    %cst = arith.constant dense<0.000000e+00> : vector<8x512xf32>
    %3 = tpu.matmul %1, %2, %cst {dimension_numbers = #tpu.dot_dimension_numbers<[1], [0], [0], [1], [0, 0, 1, 1], [], []>} : vector<8x32xf32>, vector<32x512xf32>, vector<8x512xf32> -> vector<8x512xf32>
    %c0_4 = arith.constant 0 : index
    %c0_5 = arith.constant 0 : index
    %4 = vector.load %arg4[%c0_4, %c0_5] : memref<2x512xf32, #tpu.memory_space<vmem>>, vector<1x512xf32>
    %5 = vector.broadcast %4 : vector<1x512xf32> to vector<8x512xf32>
    %6 = arith.mulf %3, %5 : vector<8x512xf32>
    %c1 = arith.constant 1 : index
    %c0_6 = arith.constant 0 : index
    %7 = vector.load %arg4[%c1, %c0_6] : memref<2x512xf32, #tpu.memory_space<vmem>>, vector<1x512xf32>
    %8 = vector.broadcast %7 : vector<1x512xf32> to vector<8x512xf32>
    %9 = arith.addf %6, %8 : vector<8x512xf32>
    %10 = math.sin %9 : vector<8x512xf32>
    %c0_7 = arith.constant 0 : index
    %c0_8 = arith.constant 0 : index
    %c0_9 = arith.constant 0 : index
    %11 = vector.load %arg5[%c0_7, %c0_8, %c0_9] : memref<1x8x512xf32, #tpu.memory_space<vmem>>, vector<1x8x512xf32>
    %12 = vector.shape_cast %11 : vector<1x8x512xf32> to vector<8x512xf32>
    %13 = vector.shape_cast %10 : vector<8x512xf32> to vector<1x8x512xf32>
    tpu.vector_store %arg5[%c0_7, %c0_8, %c0_9], %13 {strides = array<i32>} : memref<1x8x512xf32, #tpu.memory_space<vmem>>, vector<1x8x512xf32>,
    return
  }
  func.func @transform_0(%arg0: i32, %arg1: i32) -> (i32, i32, i32) {
    %c0_i32 = arith.constant 0 : i32
    %c0_i32_0 = arith.constant 0 : i32
    return %arg0, %arg1, %c0_i32 : i32, i32, i32
  }
  func.func @transform_1(%arg0: i32, %arg1: i32) -> (i32, i32) {
    %c0_i32 = arith.constant 0 : i32
    %c0_i32_0 = arith.constant 0 : i32
    %c0_i32_1 = arith.constant 0 : i32
    return %c0_i32, %c0_i32_0 : i32, i32
  }
  func.func @transform_2(%arg0: i32, %arg1: i32) -> (i32, i32) {
    %c0_i32 = arith.constant 0 : i32
    %c0_i32_0 = arith.constant 0 : i32
    %c0_i32_1 = arith.constant 0 : i32
    return %c0_i32, %c0_i32_0 : i32, i32
  }
  func.func @transform_3(%arg0: i32, %arg1: i32) -> (i32, i32, i32) {
    %c0_i32 = arith.constant 0 : i32
    %c0_i32_0 = arith.constant 0 : i32
    return %arg0, %arg1, %c0_i32 : i32, i32, i32
  }
}

</mosaic_0001>

<bundles_post_ra>
// kernel: tpu_custom_call.1
= control target key start
LH: loop header
LB: loop body
LE: loop exit
PB: predicated region body
PF: predicated region fallthrough
CT: control target
= control target key end

     0   :  { %s2106_s0 = inlined_call_operand.hbm [shape: f32[2,16,32], index: 0, kind: input, shape index: {}]   ;;  %s2107_s1 = inlined_call_operand.hbm [shape: f32[32,512], index: 1, kind: input, shape index: {}]   ;;  %s2108_s2 = inlined_call_operand.hbm [shape: f32[2,512], index: 2, kind: input, shape index: {}]   ;;  %s2109_s3 = inlined_call_operand.hbm [shape: f32[2,16,512], index: 3, kind: output, shape index: {}]  }
   0x1   :  { %2112 = sst [smem:[#allocation14_spill]] %s2107_s1 }
   0x2   :  { %2113 = sst [smem:[#allocation15_spill]] %s2108_s2 }
   0x3   :  { %8 = vsyncpa [#allocation3], 0 }
   0x4   :  { %10 = vsyncpa [#allocation3 + $0x1], 0 }
   0x5   :  { %11 = vsyncpa [#allocation6], 0 }
   0x6   :  { %12 = vsyncpa [#allocation4], 0 }
   0x7   :  { %14 = vsyncpa [#allocation4 + $0x1], 0  ;;  %s1484_s12 = smov 0   ;;  %s1486_s13 = smov 0  }
   0x8   :  { %s1488_s14 = smov 0   ;;  %s1490_s15 = smov 0  }
   0x9   :  { %s1492_s16 = smov 0   ;;  %s1494_s17 = smov 0  }
   0xa   :  { %s1496_s18 = smov 0   ;;  %s1498_s19 = smov 0  }
   0xb LB: > { %s1115_s20 = sadd.s32 4294967295, %s1451_s19   ;;  %p1117_p0 = scmp.ge.s32.totalorder %s1451_s19, 1  ;;  %s1451_s19 = sphi %s1498_s19, %s20_s19   ;;  %s1447_s18 = sphi %s1496_s18, %s2140_s18   ;;  %s1443_s17 = sphi %s1494_s17, %s2139_s17   ;;  %s1439_s16 = sphi %s1492_s16, %s2138_s16   ;;  %s1435_s15 = sphi %s1490_s15, %s2137_s15   ;;  %s1431_s14 = sphi %s1488_s14, %s2136_s14   ;;  %s1427_s13 = sphi %s1486_s13, %s2135_s13   ;;  %s1423_s12 = sphi %s1484_s12, %s2134_s12  }
   0xc   : > { %p1528_p1 = scmp.eq.s32.totalorder %s1115_s20, 0  ;;  %p135_p2 = scmp.lt.s32.totalorder %s1451_s19, 5 }
   0xd   : > { %s2115_s1 = sld [smem:[#allocation14_spill]]  ;;  %s1453_s26 = smov [#allocation5]  }
   0xe   : > { %p1536_p3 = pnand %p1117_p0, %p135_p2  ;;  %s148_s27 = sshll.u32 %s1453_s26, 4  ;;  %s149_s27 = int_to_ptr.vmem [resolvable:$true] %s148_s27 }
   0xf   : > { %s2117_s2 = sld [smem:[#allocation15_spill]]  ;;  %s1454_s4 = smov 512  }
  0x10   : > { %p1163_p4 = pneg %p1536_p3  ;;  %s1455_s5 = smov 32  }
  0x11   : > { %s1456_s6 = smov [#allocation7]   ;;  %s1116_s8 = sadd.s32 4294967294, %s1451_s19  }
  0x12   : > { %p1164_p5 = pnand %p1163_p4, %p1528_p1  ;;  %s163_s7 = sshll.u32 %s1456_s6, 4  ;;  %s164_s7 = int_to_ptr.vmem [resolvable:$true] %s163_s7 }
  0x13   : > { %s146_s24 = sshll.u32 %s2115_s1, 4  ;;  %s29_s9 = sadd.s32 1, %s1443_s17  ;;  %s147_s24 = int_to_ptr.hbm [resolvable:$true] %s146_s24 }
  0x14   : > { %1166 = dma.hbm_to_vmem [thread:$0]  (!%p1164_p5), %s147_s24, 2048, %s149_s27, [#allocation6], %s1454_s4, %s1454_s4, %s1455_s5  }
  0x15   : > { %s161_s30 = sshll.u32 %s2117_s2, 4  ;;  %p30_p6 = scmp.ge.s32.totalorder %s29_s9, 2  ;;  %s162_s30 = int_to_ptr.hbm [resolvable:$true] %s161_s30 }
  0x16   : > { %1169 = dma.hbm_to_vmem [thread:$0]  (!%p1164_p5), %s162_s30, 128, %s164_s7, [#allocation6]  }
  0x17   : > { %s32_s10 = sadd.s32 1, %s1447_s18  ;;  %s41_s11 = sadd.s32 1, %s1431_s14 }
  0x18   : > { %p48_p7 = scmp.ne.s32.totalorder %s1431_s14, %s1427_s13  ;;  %s2142_s9 = smov (%p30_p6, %s29_s9), 0 }
  0x19   : > { %2118 = sst [smem:[#allocation12_spill]] %s2142_s9  ;;  %s2144_s10 = smov (!%p30_p6, %s32_s10), %s1447_s18 }
  0x1a   : > { %s37_s22 = ssub.s32 %s1443_s17, %s2142_s9  ;;  %p49_p8 = scmp.eq.s32.totalorder %s1451_s19, 0 }
  0x1b   : > { %p34_p9 = scmp.ge.s32.totalorder %s2144_s10, 2  ;;  %p54_p10 = scmp.ne.s32.totalorder %s1427_s13, %s1423_s12 }
  0x1c   : > { %p1561_p11 = por %p49_p8, %p48_p7  ;;  %p122_p12 = scmp.eq.s32.totalorder %s1115_s20, 3 }
  0x1d   : > { %s2146_s10 = smov (%p34_p9, %s2144_s10), 0  ;;  %p1571_p13 = por %p1528_p1, %p54_p10 }
  0x1e   : > { %2120 = sst [smem:[#allocation13_spill]] %s2146_s10  ;;  %p1575_p0 = por %p122_p12, %p48_p7 }
  0x1f   : > { %s36_s27 = ssub.s32 %s1447_s18, %s2146_s10  ;;  %p128_p2 = scmp.eq.s32.totalorder %s1116_s8, 3 }
  0x20   : > { %s38_s28 = sor.u32 %s37_s22, %s36_s27  ;;  %p1180_p4 = scmp.lt.s32.totalorder %s1451_s19, 4 }
  0x21   : > { %p39_p5 = scmp.eq.s32.totalorder %s38_s28, 0  ;;  %p1582_p6 = por %p128_p2, %p54_p10 }
  0x22   : > { %s174_s29 = sand.u32 1, %s1431_s14   ;;  %s1122_s30 = sshll.u32 %s1447_s18, 1 }
  0x23   : > { %s1589_s4 = scalar_select %p39_p5, %s1431_s14, %s41_s11  }
  0x24   : > { %s1121_s5 = sshll.u32 %s174_s29, 3  ;;  %s182_s6 = sadd.s32 %s1443_s17, %s1122_s30 }
  0x25   : > { %s1123_s7 = sshll.u32 %s182_s6, 3  ;;  %s178_s1 = scalar_lea.vmem [#allocation2], %s1121_s5 }
  0x26   : > { %s188_s2 = sshll.u32 %s178_s1, 4  ;;  %s184_s9 = scalar_lea.hbm %s2106_s0, %s1123_s7  ;;  %s189_s2 = int_to_ptr.vmem [resolvable:$true] %s188_s2 }
  0x27   : > { %s186_s22 = sshll.u32 %s184_s9, 4  ;;  %p1171_p7 = pnand %p1180_p4, %p1561_p11  ;;  %s187_s22 = int_to_ptr.hbm [resolvable:$true] %s186_s22 }
  0x28   : > { %s175_s27 = scalar_lea.sflag [#allocation3], %s174_s29  ;;  %197 = sbr.rel (%p1536_p3) target bundleno = 384 (0x180), region = 32 }
  0x29   : > { %1173 = dma.hbm_to_vmem [thread:$0]  (!%p1171_p7), %s187_s22, 128, %s189_s2, %s175_s27  }
  0x2a   : > { %s1602_s11 = sand.u32 (!%p1536_p3), 1, %s1427_s13  }
  0x2b   : > { %s1125_s1 = sshll.u32 (!%p1536_p3), %s1602_s11, 3  ;;  %s200_s10 = scalar_lea.sflag (!%p1536_p3), [#allocation3], %s1602_s11 }
  0x2c   : > { %s1606_s28 = scalar_lea.vmem (!%p1536_p3), [#allocation2], %s1125_s1 }
  0x2d   : > { %1410 = dma.done.wait (%p1571_p13), %s200_s10, 128  }
  0x2e   : > { %1412 = vsyncadd (%p1571_p13), %s200_s10, 4294967168 }
  0x2f   : > { %1414 = dma.done.wait (%p1528_p1), [#allocation6], 2176  }
  0x30   : > { %1416 = vsyncadd (%p1528_p1), [#allocation6], 4294965120  ;;  %v250_v0 = vld [vmem:[#allocation5 + $0x60] sm:$0xff]  ;;  %v251_v1 = vld [vmem:[#allocation5 + $0x68] sm:$0xff]  ;;  %vm254_vm0 = vcmask 261120   ;;  %s1128_s2 = sshll.u32 %s1602_s11, 5 }
  0x31   : > { %v252_v2 = vld [vmem:[#allocation5 + $0x70] sm:$0xff]  ;;  %270 = vmatpush.msra.mxu0 %v250_v0  ;;  %290 = vmatpush.msra.mxu1 %v251_v1  ;;  %v253_v3 = vld [vmem:[#allocation5 + $0x78] sm:$0xff]  ;;  %v246_v4 = vld [vmem:[#allocation5 + $0x40] sm:$0xff]  ;;  %v1457_v55 = vmov 683565275   ;;  %s1942_s21 = scalar_lea.vmem [#allocation8], %s1128_s2 }
  0x32   : > { %v247_v5 = vld [vmem:[#allocation5 + $0x48] sm:$0xff]  ;;  %310 = vmatpush.msra.mxu2 %v252_v2  ;;  %330 = vmatpush.msra.mxu3 %v253_v3  ;;  %v248_v6 = vld [vmem:[#allocation5 + $0x50] sm:$0xff]  ;;  %v249_v7 = vld [vmem:[#allocation5 + $0x58] sm:$0xff]  ;;  %v1458_v57 = vmov 2475754826   ;;  %s1146_s25 = sshll.u32 %s1435_s15, 2 }
  0x33   : > { %v242_v8 = vld [vmem:[#allocation5 + $0x20] sm:$0xff]  ;;  %271 = vmatpush.msra.mxu0 %v246_v4  ;;  %291 = vmatpush.msra.mxu1 %v247_v5  ;;  %v243_v9 = vld [vmem:[#allocation5 + $0x28] sm:$0xff]  ;;  %v244_v10 = vld [vmem:[#allocation5 + $0x30] sm:$0xff]  ;;  %v1459_v59 = vmov 2131351028   ;;  %s1147_s9 = sshll.u32 %s1439_s16, 3 }
  0x34   : > { %v245_v11 = vld [vmem:[#allocation5 + $0x38] sm:$0xff]  ;;  %311 = vmatpush.msra.mxu2 %v248_v6  ;;  %331 = vmatpush.msra.mxu3 %v249_v7  ;;  %v238_v12 = vld [vmem:[#allocation5] sm:$0xff]  ;;  %v239_v13 = vld [vmem:[#allocation5 + $0x8] sm:$0xff]  ;;  %v1460_v61 = vmov 2102212464   ;;  %s1003_s23 = sadd.s32 %s1147_s9, %s1146_s25  ;;  %s1007_s16 = sshll.u32 %s1942_s21, 4  ;;  %s1008_s16 = int_to_ptr.vmem [resolvable:$true] %s1007_s16 }
  0x35   : > { %272 = vmatpush.msra.mxu0 %v242_v8  ;;  %292 = vmatpush.msra.mxu1 %v243_v9  ;;  %v240_v14 = vld [vmem:[#allocation5 + $0x10] sm:$0xff]  ;;  %v241_v15 = vld [vmem:[#allocation5 + $0x18] sm:$0xff]  ;;  %v1617_v17 = vld [vmem:[#allocation7] ss:$2 sm:$0xf]  ;;  %s1148_s24 = sshll.u32 %s1003_s23, 3 }
  0x36   : > { %312 = vmatpush.msra.mxu2 %v244_v10  ;;  %332 = vmatpush.msra.mxu3 %v245_v11  ;;  %v237_v16 = vld [vmem:[%s1606_s28] sm:$0xff]  ;;  %v1619_v18 = vld [vmem:[#allocation7 + $0x1] ss:$2 sm:$0xf]  ;;  %v340_v19 = vperm.slane %v1617_v17, 0  ;;  %v341_v20 = vperm.slane %v1617_v17, 1  ;;  %s1005_s15 = scalar_lea.hbm %s2109_s3, %s1148_s24 }
  0x37   : > { %273 = vmatpush.msra.mxu0 %v238_v12  ;;  %293 = vmatpush.msra.mxu1 %v239_v13  ;;  %v355_v21 = vperm.slane %v1619_v18, 0  ;;  %v356_v22 = vperm.slane %v1619_v18, 1  ;;  %v342_v36 = vperm.slane %v1617_v17, 2  ;;  %v357_v45 = vperm.slane %v1619_v18, 2  ;;  %s1009_s5 = sshll.u32 %s1005_s15, 4  ;;  %s992_s6 = scalar_lea.sflag [#allocation4], %s1602_s11  ;;  %s1010_s5 = int_to_ptr.hbm [resolvable:$true] %s1009_s5 }
  0x38   : > { %313 = vmatpush.msra.mxu2 %v240_v14  ;;  %333 = vmatpush.msra.mxu3 %v241_v15  ;;  %v1461_v63 = vmov 920167782   ;;  %v1462_v8 = vmov 1326507024   ;;  %s1363_s7 = sshra.s32 %s1010_s5, 4  ;;  %s1369_s1 = scalar_lea.hbm %s2109_s3, 128  ;;  %s1364_s7 = int_to_ptr.hbm [resolvable:$true] %s1363_s7 }
  0x39   : > { %1129 = vmatmul.msk.f32.vlgmr.msra.gmra.mxu0 %vm254_vm0, %v237_v16  ;;  %1130 = vmatmul.msk.f32.vlgmr.msra.gmra.mxu1 %vm254_vm0, %v237_v16  ;;  %s1365_s8 = scalar_lea.hbm %s1364_s7, 32  ;;  %p1370_p9 = scmp.lt.s32.totalorder %s1364_s7, %s2109_s3 }
  0x3a   : > { %1131 = vmatmul.msk.f32.vlgmr.msra.gmra.mxu2 %vm254_vm0, %v237_v16  ;;  %1132 = vmatmul.msk.f32.vlgmr.msra.gmra.mxu3 %vm254_vm0, %v237_v16  ;;  %p1366_p1 = scmp.ne.s32.totalorder %s1364_s7, %s1365_s8  ;;  %p1371_p10 = scmp.lt.s32.totalorder %s1369_s1, %s1365_s8 }
  0x3c   : > { %p1367_p3 = pnand %p1366_p1, %p1575_p0  ;;  %p1372_p11 = por %p1371_p10, %p1370_p9 }
  0x3e   : > { %p1368_p8 = pneg %p1367_p3 }
  0x40   : > { %p1373_p12 = pnand %p1372_p11, %p1368_p8 }
  0xb6   : > { %v275_v23 = vpop.f32.mrf.mxu0  ;;  %v295_v24 = vpop.f32.mrf.mxu1 }
  0xb7   : > { %v348_v25 = vmul.f32 %v340_v19, %v275_v23  ;;  %v349_v26 = vmul.f32 %v341_v20, %v295_v24 }
  0xb9   : > { %v1625_v27 = vadd.f32 %v355_v21, %v348_v25  ;;  %v1627_v28 = vadd.f32 %v356_v22, %v349_v26 }
  0xbb   : > { %v367_v29 = vand.u32 2147483647, %v1625_v27  ;;  %v370_v30 = vand.u32 2139095040, %v1625_v27  ;;  %v522_v31 = vand.u32 2147483647, %v1627_v28  ;;  %v525_v32 = vand.u32 2139095040, %v1627_v28 }
  0xbd   : > { %v371_v33 = vshrl.u32 %v370_v30, 23  ;;  %v374_v34 = vand.u32 8388607, %v367_v29  ;;  %v526_v35 = vshrl.u32 %v525_v32, 23  ;;  %v315_v38 = vpop.f32.mrf.mxu2  ;;  %v529_v41 = vand.u32 8388607, %v522_v31 }
  0xbe   : > { %v350_v44 = vmul.f32 %v342_v36, %v315_v38 }
  0xbf   : > { %v1133_v37 = vadd.s32 4294967169, %v371_v33  ;;  %v375_v39 = vor.u32 8388608, %v374_v34  ;;  %v1136_v40 = vadd.s32 4294967169, %v526_v35  ;;  %v530_v48 = vor.u32 8388608, %v529_v41 }
  0xc0   : > { %v1645_v53 = vadd.f32 %v357_v45, %v350_v44 }
  0xc1   : > { %v377_v42 = vadd.s32 1, %v1133_v37  ;;  %v532_v43 = vadd.s32 1, %v1136_v40  ;;  %v1639_v47 = vshll.u32 %v375_v39, 8  ;;  %v1653_v2 = vshll.u32 %v530_v48, 8 }
  0xc2   : > { %v680_v16 = vand.u32 2139095040, %v1645_v53 }
  0xc3   : > { %vm378_vm1 = vcmp.gt.s32.totalorder %v377_v42, 0  ;;  %vm533_vm2 = vcmp.gt.s32.totalorder %v532_v43, 0  ;;  %v416_v1 = vand.u32 65535, %v1639_v47  ;;  %v417_v6 = vshrl.u32 %v1639_v47, 16 }
  0xc4   : > { %v379_v46 = vsel %vm378_vm1, %v377_v42, 0  ;;  %v534_v50 = vsel %vm533_vm2, %v532_v43, 0  ;;  %v1697_v37 = vand.u32 65535, %v1653_v2 }
  0xc5   : > { %v381_v49 = vand.u32 31, %v379_v46  ;;  %v1641_v51 = vshrl.u32 %v379_v46, 5  ;;  %v1643_v52 = vand.u32 31, %v534_v50  ;;  %v1703_v44 = vshrl.u32 %v534_v50, 5 }
  0xc7   : > { %v382_v54 = vsub.s32 32, %v381_v49  ;;  %v384_v56 = vshll.u32 %v1457_v55, %v381_v49  ;;  %v387_v58 = vshll.u32 %v1458_v57, %v381_v49  ;;  %v390_v60 = vshll.u32 %v1459_v59, %v381_v49 }
  0xc8   : > { %v393_v62 = vshll.u32 %v1460_v61, %v381_v49  ;;  %v396_v0 = vshll.u32 %v1461_v63, %v381_v49  ;;  %vm399_vm3 = vcmp.lt.s32.totalorder %v1641_v51, 1  ;;  %vm402_vm4 = vcmp.lt.s32.totalorder %v1641_v51, 4 }
  0xc9   : > { %v385_v3 = vshrl.u32 %v1458_v57, %v382_v54  ;;  %v388_v4 = vshrl.u32 %v1459_v59, %v382_v54  ;;  %v391_v5 = vshrl.u32 %v1460_v61, %v382_v54  ;;  %v394_v7 = vshrl.u32 %v1461_v63, %v382_v54 }
  0xca   : > { %v397_v9 = vshrl.u32 %v1462_v8, %v382_v54  ;;  %v1664_v13 = vsub.s32 32, %v1643_v52  ;;  %vm401_vm5 = vcmp.lt.s32.totalorder %v1641_v51, 3  ;;  %v383_v19 = vshrl.u32 %v1457_v55, %v382_v54 }
  0xcb   : > { %v386_v10 = vor.u32 %v385_v3, %v384_v56  ;;  %v389_v11 = vor.u32 %v388_v4, %v387_v58  ;;  %v392_v12 = vor.u32 %v391_v5, %v390_v60  ;;  %v395_v14 = vor.u32 %v394_v7, %v393_v62 }
  0xcc   : > { %v398_v15 = vor.u32 %v397_v9, %v396_v0  ;;  %vm400_vm6 = vcmp.lt.s32.totalorder %v1641_v51, 2  ;;  %v539_v24 = vshll.u32 %v1457_v55, %v1643_v52  ;;  %v542_v25 = vshll.u32 %v1458_v57, %v1643_v52 }
  0xcd   : > { %v407_v20 = vsel %vm399_vm3, %v386_v10, %v389_v11  ;;  %v411_v21 = vsel %vm399_vm3, %v389_v11, %v392_v12  ;;  %v408_v22 = vsel %vm402_vm4, %v395_v14, 920167782  ;;  %v404_v26 = vsel %vm402_vm4, %v392_v12, 2102212464 }
  0xce   : > { %v412_v23 = vsel %vm402_vm4, %v398_v15, 1326507024  ;;  %v409_v30 = vsel %vm401_vm5, %v392_v12, %v408_v22  ;;  %v540_v33 = vshrl.u32 %v1458_v57, %v1664_v13  ;;  %v543_v36 = vshrl.u32 %v1459_v59, %v1664_v13 }
  0xcf   : > { %v413_v32 = vsel %vm401_vm5, %v395_v14, %v412_v23  ;;  %v410_v34 = vsel %vm400_vm6, %v407_v20, %v409_v30  ;;  %v403_v42 = vsel %vm399_vm3, %v383_v19, %v386_v10  ;;  %v405_v43 = vsel %vm401_vm5, %v389_v11, %v404_v26 }
  0xd0   : > { %v414_v35 = vsel %vm400_vm6, %v411_v21, %v413_v32  ;;  %v440_v40 = vand.u32 65535, %v410_v34  ;;  %v441_v41 = vshrl.u32 %v410_v34, 16  ;;  %v1705_v45 = vor.u32 %v540_v33, %v539_v24 }
  0xd1   : > { %v418_v38 = vand.u32 65535, %v414_v35  ;;  %v419_v39 = vshrl.u32 %v414_v35, 16  ;;  %v1707_v49 = vor.u32 %v543_v36, %v542_v25  ;;  %v545_v54 = vshll.u32 %v1459_v59, %v1643_v52 }
  0xd2   : > { %v443_v58 = vmul.u32 %v441_v41, %v416_v1  ;;  %v444_v60 = vmul.u32 %v440_v40, %v417_v6  ;;  %v546_v62 = vshrl.u32 %v1460_v61, %v1664_v13  ;;  %v442_v4 = vmul.u32 %v440_v40, %v416_v1 }
  0xd3   : > { %v421_v46 = vmul.u32 %v419_v39, %v416_v1  ;;  %v422_v48 = vmul.u32 %v418_v38, %v417_v6  ;;  %v420_v56 = vmul.u32 %v418_v38, %v416_v1  ;;  %v423_v0 = vmul.u32 %v419_v39, %v417_v6 }
  0xd4   : > { %v445_v50 = vmul.u32 %v441_v41, %v417_v6  ;;  %v446_v10 = vshll.u32 %v443_v58, 16  ;;  %v448_v12 = vshll.u32 %v444_v60, 16  ;;  %v548_v14 = vshll.u32 %v1460_v61, %v1643_v52 }
  0xd5   : > { %v424_v3 = vshll.u32 %v421_v46, 16  ;;  %v425_v5 = vshrl.u32 %v421_v46, 16  ;;  %v426_v7 = vshll.u32 %v422_v48, 16  ;;  %v427_v9 = vshrl.u32 %v422_v48, 16 }
  0xd6   : > { %v1463_v15 = vmov 0   ;;  %vm450_vm8 = vc.u32 %v442_v4, %v446_v10  ;;  %v452_v20 = vadd.s32 %v446_v10, %v442_v4  ;;  %v549_v21 = vshrl.u32 %v1461_v63, %v1664_v13 }
  0xd7   : > { %vm428_vm7 = vc.u32 %v420_v56, %v424_v3  ;;  %v430_v11 = vadd.s32 %v424_v3, %v420_v56  ;;  %v451_v6 = vsel %vm450_vm8, 1, %v1463_v15  ;;  %v551_v22 = vshll.u32 %v1461_v63, %v1643_v52 }
  0xd8   : > { %v429_v19 = vsel %vm428_vm7, 1, %v1463_v15  ;;  %v453_v24 = vadd.s32 %v451_v6, %v445_v50  ;;  %vm454_vm10 = vc.u32 %v452_v20, %v448_v12  ;;  %v547_v25 = vor.u32 %v546_v62, %v545_v54 }
  0xd9   : > { %v431_v1 = vadd.s32 %v429_v19, %v423_v0  ;;  %vm432_vm9 = vc.u32 %v430_v11, %v426_v7  ;;  %v455_v30 = vsel %vm454_vm10, 1, %v1463_v15  ;;  %v550_v32 = vor.u32 %v549_v21, %v548_v14 }
  0xda   : > { %v433_v23 = vsel %vm432_vm9, 1, %v1463_v15  ;;  %v552_v33 = vshrl.u32 %v1462_v8, %v1664_v13  ;;  %v447_v34 = vshrl.u32 %v443_v58, 16  ;;  %v457_v35 = vadd.s32 %v455_v30, %v453_v24 }
  0xdb   : > { %v435_v26 = vadd.s32 %v433_v23, %v431_v1  ;;  %vm554_vm11 = vcmp.lt.s32.totalorder %v1703_v44, 1  ;;  %vm556_vm12 = vcmp.lt.s32.totalorder %v1703_v44, 3  ;;  %v449_v52 = vshrl.u32 %v444_v60, 16 }
  0xdc   : > { %v553_v38 = vor.u32 %v552_v33, %v551_v22  ;;  %vm557_vm13 = vcmp.lt.s32.totalorder %v1703_v44, 4  ;;  %v1728_v39 = vadd.s32 %v452_v20, %v448_v12  ;;  %v458_v40 = vadd.s32 %v457_v35, %v447_v34 }
  0xdd   : > { %v436_v36 = vadd.s32 %v435_v26, %v425_v5  ;;  %v562_v41 = vsel %vm554_vm11, %v1705_v45, %v1707_v49  ;;  %v563_v46 = vsel %vm557_vm13, %v550_v32, 920167782  ;;  %vm555_vm14 = vcmp.lt.s32.totalorder %v1703_v44, 2 }
  0xde   : > { %v564_v54 = vsel %vm556_vm12, %v547_v25, %v563_v46  ;;  %v566_v56 = vsel %vm554_vm11, %v1707_v49, %v547_v25  ;;  %v406_v58 = vsel %vm400_vm6, %v403_v42, %v405_v43  ;;  %v459_v60 = vadd.s32 %v458_v40, %v449_v52 }
  0xdf   : > { %v1736_v48 = vadd.s32 %v436_v36, %v427_v9  ;;  %v565_v62 = vsel %vm555_vm14, %v562_v41, %v564_v54  ;;  %v567_v0 = vsel %vm557_vm13, %v553_v38, 1326507024  ;;  %v572_v4 = vshrl.u32 %v1653_v2, 16 }
  0xe0   : > { %v568_v3 = vsel %vm556_vm12, %v550_v32, %v567_v0  ;;  %v595_v50 = vand.u32 65535, %v565_v62  ;;  %v463_v5 = vadd.s32 1, %v459_v60  ;;  %v596_v42 = vshrl.u32 %v565_v62, 16 }
  0xe1   : > { %vm462_vm15 = vc.u32 %v1736_v48, %v1728_v39  ;;  %v569_v51 = vsel %vm555_vm14, %v566_v56, %v568_v3  ;;  %v681_v43 = vshrl.u32 %v680_v16, 23  ;;  %v460_v7 = vmul.u32 %v1639_v47, %v406_v58 }
  0xe2   : > { %v573_v9 = vand.u32 65535, %v569_v51  ;;  %v574_v10 = vshrl.u32 %v569_v51, 16  ;;  %v464_v11 = vsel %vm462_vm15, %v463_v5, %v459_v60  ;;  %v538_v12 = vshrl.u32 %v1457_v55, %v1664_v13 }
  0xe3   : > { %v598_v14 = vmul.u32 %v596_v42, %v1697_v37  ;;  %v599_v19 = vmul.u32 %v595_v50, %v572_v4  ;;  %v465_v20 = vadd.s32 %v464_v11, %v460_v7  ;;  %v559_v21 = vsel %vm557_vm13, %v547_v25, 2102212464 }
  0xe4   : > { %v576_v1 = vmul.u32 %v574_v10, %v1697_v37  ;;  %v577_v6 = vmul.u32 %v573_v9, %v572_v4  ;;  %v597_v16 = vmul.u32 %v595_v50, %v1697_v37  ;;  %v600_v22 = vmul.u32 %v596_v42, %v572_v4 }
  0xe5   : > { %v601_v47 = vshll.u32 %v598_v14, 16  ;;  %v1139_v23 = vadd.s32 4294967169, %v681_v43  ;;  %v466_v24 = vadd.s32 536870912, %v465_v20  ;;  %v575_v26 = vmul.u32 %v573_v9, %v1697_v37 }
  0xe6   : > { %v578_v30 = vmul.u32 %v574_v10, %v572_v4  ;;  %v579_v13 = vshll.u32 %v576_v1, 16  ;;  %v581_v32 = vshll.u32 %v577_v6, 16  ;;  %v603_v33 = vshll.u32 %v599_v19, 16 }
  0xe7   : > { %vm605_vm0 = vc.u32 %v597_v16, %v601_v47  ;;  %v607_v34 = vadd.s32 %v601_v47, %v597_v16  ;;  %v467_v35 = vshrl.u32 %v466_v24, 30  ;;  %v677_v40 = vand.u32 2147483647, %v1645_v53 }
  0xe8   : > { %vm583_vm1 = vc.u32 %v575_v26, %v579_v13  ;;  %v585_v25 = vadd.s32 %v579_v13, %v575_v26  ;;  %v606_v36 = vsel %vm605_vm0, 1, %v1463_v15  ;;  %v558_v37 = vsel %vm554_vm11, %v538_v12, %v1705_v45 }
  0xe9   : > { %v584_v52 = vsel %vm583_vm1, 1, %v1463_v15  ;;  %v608_v38 = vadd.s32 %v606_v36, %v600_v22  ;;  %vm609_vm2 = vc.u32 %v607_v34, %v603_v33  ;;  %v468_v41 = vshll.u32 %v467_v35, 30 }
  0xea   : > { %v586_v46 = vadd.s32 %v584_v52, %v578_v30  ;;  %vm587_vm3 = vc.u32 %v585_v25, %v581_v32  ;;  %v560_v54 = vsel %vm556_vm12, %v1707_v49, %v559_v21  ;;  %v610_v58 = vsel %vm609_vm2, 1, %v1463_v15 }
  0xeb   : > { %v588_v56 = vsel %vm587_vm3, 1, %v1463_v15  ;;  %v687_v60 = vadd.s32 1, %v1139_v23  ;;  %v469_v62 = vsub.s32 %v465_v20, %v468_v41  ;;  %v580_v0 = vshrl.u32 %v576_v1, 16 }
  0xec   : > { %v590_v3 = vadd.s32 %v588_v56, %v586_v46  ;;  %v612_v4 = vadd.s32 %v610_v58, %v608_v38  ;;  %vm369_vm4 = vcmp.lt.s32.totalorder %v1625_v27, 0  ;;  %v491_v50 = vsub.s32 4, %v467_v35 }
  0xed   : > { %v602_v5 = vshrl.u32 %v598_v14, 16  ;;  %vm688_vm5 = vcmp.gt.s32.totalorder %v687_v60, 0  ;;  %vm470_vm6 = vcmp.lt.s32.totalorder %v469_v62, 0  ;;  %v471_v45 = vsub.s32 0, %v469_v62 }
  0xee   : > { %v582_v51 = vshrl.u32 %v577_v6, 16  ;;  %v591_v42 = vadd.s32 %v590_v3, %v580_v0  ;;  %v561_v49 = vsel %vm555_vm14, %v558_v37, %v560_v54  ;;  %v604_v43 = vshrl.u32 %v599_v19, 16 }
  0xef   : > { %v613_v7 = vadd.s32 %v612_v4, %v602_v5  ;;  %v689_v9 = vsel %vm688_vm5, %v687_v60, 0  ;;  %v472_v10 = vsel %vm470_vm6, %v471_v45, %v469_v62  ;;  %v1784_v12 = vadd.s32 %v607_v34, %v603_v33 }
  0xf0   : > { %v1782_v11 = vadd.s32 %v591_v42, %v582_v51  ;;  %v684_v20 = vand.u32 8388607, %v677_v40  ;;  %v473_v14 = vclz %v472_v10  ;;  %v492_v21 = vsel %vm369_vm4, %v491_v50, %v467_v35 }
  0xf1   : > { %v614_v1 = vadd.s32 %v613_v7, %v604_v43  ;;  %v691_v6 = vand.u32 31, %v689_v9  ;;  %vm1792_vm7 = vcmp.le.f32.partialorder %v367_v29, 0.7853982  ;;  %v461_v19 = vadd.s32 %v1728_v39, %v1736_v48 }
  0xf2   : > { %v615_v16 = vmul.u32 %v1653_v2, %v561_v49  ;;  %v1134_v22 = vadd.s32 4294967294, %v473_v14  ;;  %vm617_vm8 = vc.u32 %v1782_v11, %v1784_v12  ;;  %v494_v24 = vsel %vm1792_vm7, 0, %v492_v21 }
  0xf3   : > { %v618_v47 = vadd.s32 1, %v614_v1  ;;  %v1801_v23 = vsub.s32 32, %v691_v6  ;;  %v685_v26 = vor.u32 8388608, %v684_v20  ;;  %v1805_v29 = vshrl.u32 %v689_v9, 5 }
  0xf4   : > { %v694_v30 = vshll.u32 %v1457_v55, %v691_v6  ;;  %vm1135_vm9 = vcmp.lt.s32.totalorder %v1134_v22, 0  ;;  %v697_v39 = vshll.u32 %v1458_v57, %v691_v6  ;;  %v700_v34 = vshll.u32 %v1459_v59, %v691_v6 }
  0xf5   : > { %v619_v13 = vsel %vm617_vm8, %v618_v47, %v614_v1  ;;  %v695_v2 = vshrl.u32 %v1458_v57, %v1801_v23  ;;  %v476_v48 = vsel %vm1135_vm9, 0, %v1134_v22  ;;  %v698_v33 = vshrl.u32 %v1459_v59, %v1801_v23 }
  0xf6   : > { %v620_v32 = vadd.s32 %v619_v13, %v615_v16  ;;  %v477_v35 = vsub.s32 32, %v476_v48  ;;  %v481_v25 = vsub.s32 4294967266, %v476_v48  ;;  %v701_v36 = vshrl.u32 %v1460_v61, %v1801_v23 }
  0xf7   : > { %v703_v52 = vshll.u32 %v1460_v61, %v691_v6  ;;  %v478_v38 = vshll.u32 %v469_v62, %v476_v48  ;;  %v696_v37 = vor.u32 %v695_v2, %v694_v30  ;;  %v704_v46 = vshrl.u32 %v1461_v63, %v1801_v23 }
  0xf8   : > { %v621_v41 = vadd.s32 536870912, %v620_v32  ;;  %v479_v54 = vshrl.u32 %v461_v19, %v477_v35  ;;  %v482_v56 = vadd.s32 127, %v481_v25  ;;  %v699_v58 = vor.u32 %v698_v33, %v697_v39 }
  0xf9   : > { %v707_v60 = vshrl.u32 %v1462_v8, %v1801_v23  ;;  %v705_v3 = vor.u32 %v704_v46, %v703_v52  ;;  %v1823_v4 = vshll.u32 %v685_v26, 8  ;;  %v702_v45 = vor.u32 %v701_v36, %v700_v34 }
  0xfa   : > { %v1821_v0 = vshrl.u32 %v621_v41, 30  ;;  %v480_v50 = vor.u32 %v479_v54, %v478_v38  ;;  %v483_v5 = vshll.u32 %v482_v56, 23  ;;  %v706_v62 = vshll.u32 %v1461_v63, %v691_v6 }
  0xfb   : > { %v511_v51 = vadd.s32 3, %v494_v24  ;;  %vm709_vm10 = vcmp.lt.s32.totalorder %v1805_v29, 1  ;;  %vm712_vm11 = vcmp.lt.s32.totalorder %v1805_v29, 4  ;;  %vm711_vm12 = vcmp.lt.s32.totalorder %v1805_v29, 3 }
  0xfc   : > { %v623_v42 = vshll.u32 %v1821_v0, 30  ;;  %v484_v49 = vor.u32 4788187, %v483_v5  ;;  %v708_v43 = vor.u32 %v707_v60, %v706_v62  ;;  %v717_v7 = vsel %vm709_vm10, %v696_v37, %v699_v58 }
  0xfd   : > { %v718_v10 = vsel %vm712_vm11, %v705_v3, 920167782  ;;  %v726_v20 = vand.u32 65535, %v1823_v4  ;;  %v487_v21 = vcvt.s32.f32 %v480_v50  ;;  %vm710_vm13 = vcmp.lt.s32.totalorder %v1805_v29, 2 }
  0xfe   : > { %v1831_v9 = vsub.s32 %v620_v32, %v623_v42  ;;  %v485_v14 = vand.u32 2147483647, %v484_v49  ;;  %v719_v1 = vsel %vm711_vm12, %v702_v45, %v718_v10  ;;  %v727_v16 = vshrl.u32 %v1823_v4, 16 }
  0xff   : > { %v720_v19 = vsel %vm710_vm13, %v717_v7, %v719_v1  ;;  %v1845_v47 = vand.u32 3, %v511_v51  ;;  %v721_v24 = vsel %vm709_vm10, %v699_v58, %v702_v45  ;;  %v722_v26 = vsel %vm712_vm11, %v708_v43, 1326507024 }
 0x100   : > { %vm625_vm14 = vcmp.lt.s32.totalorder %v1831_v9, 0  ;;  %v626_v6 = vsub.s32 0, %v1831_v9  ;;  %v488_v22 = vmul.f32 %v487_v21, %v485_v14  ;;  %v714_v13 = vsel %vm712_vm11, %v702_v45, 2102212464 }
 0x101   : > { %v723_v2 = vsel %vm711_vm12, %v705_v3, %v722_v26  ;;  %v343_v39 = vperm.slane %v1617_v17, 3  ;;  %v750_v34 = vand.u32 65535, %v720_v19  ;;  %v616_v35 = vadd.s32 %v1784_v12, %v1782_v11 }
 0x102   : > { %v627_v30 = vsel %vm625_vm14, %v626_v6, %v1831_v9  ;;  %v489_v48 = vxor.u32 2147483648, %v488_v22  ;;  %v724_v33 = vsel %vm710_vm13, %v721_v24, %v723_v2  ;;  %v693_v25 = vshrl.u32 %v1457_v55, %v1801_v23 }
 0x103   : > { %v628_v32 = vclz %v627_v30  ;;  %v728_v36 = vand.u32 65535, %v724_v33  ;;  %v751_v52 = vshrl.u32 %v720_v19, 16  ;;  %v646_v46 = vsub.s32 4, %v1821_v0 }
 0x104   : > { %v490_v38 = vsel %vm369_vm4, %v489_v48, %v488_v22  ;;  %v729_v54 = vshrl.u32 %v724_v33, 16  ;;  %v1873_v11 = vsel %vm709_vm10, %v693_v25, %v696_v37  ;;  %v1877_v12 = vsel %vm711_vm12, %v699_v58, %v714_v13 }
 0x105   : > { %v1137_v41 = vadd.s32 4294967294, %v628_v32  ;;  %v1869_v56 = vsel %vm1792_vm7, %v1625_v27, %v490_v38  ;;  %v1879_v23 = vmul.u32 %v728_v36, %v727_v16  ;;  %v752_v50 = vmul.u32 %v750_v34, %v726_v20 }
 0x106   : > { %v495_v60 = vmul.f32 %v1869_v56, %v1869_v56  ;;  %v731_v3 = vmul.u32 %v729_v54, %v726_v20  ;;  %v730_v44 = vmul.u32 %v728_v36, %v726_v20  ;;  %v1883_v45 = vmul.u32 %v751_v52, %v726_v20 }
 0x107   : > { %vm1138_vm15 = vcmp.lt.s32.totalorder %v1137_v41, 0  ;;  %v1885_v62 = vmul.u32 %v750_v34, %v727_v16  ;;  %v733_v49 = vmul.u32 %v729_v54, %v727_v16  ;;  %v736_v7 = vshll.u32 %v1879_v23, 16 }
 0x108   : > { %v631_v5 = vsel %vm1138_vm15, 0, %v1137_v41  ;;  %v496_v37 = vmul.f32 -0.001358992, %v495_v60  ;;  %v503_v51 = vmul.f32 -0.00019511016, %v495_v60  ;;  %v734_v43 = vshll.u32 %v731_v3, 16 }
 0x109   : > { %v632_v42 = vsub.s32 32, %v631_v5  ;;  %v636_v58 = vsub.s32 4294967266, %v631_v5  ;;  %v755_v10 = vmul.u32 %v751_v52, %v727_v16  ;;  %v633_v1 = vshll.u32 %v1831_v9, %v631_v5  ;;  %v335_v5 = vpop.f32.mrf.mxu3 }
 0x10a   : > { %v497_v14 = vadd.f32 0.041655596, %v496_v37  ;;  %v504_v21 = vadd.f32 0.008332121, %v503_v51  ;;  %vm738_vm0 = vc.u32 %v730_v44, %v734_v43  ;;  %v740_v20 = vadd.s32 %v734_v43, %v730_v44 }
 0x10b   : > { %v634_v6 = vshrl.u32 %v616_v35, %v632_v42  ;;  %v637_v19 = vadd.s32 127, %v636_v58  ;;  %v756_v22 = vshll.u32 %v1883_v45, 16  ;;  %v739_v13 = vsel %vm738_vm0, 1, %v1463_v15 }
 0x10c   : > { %v498_v24 = vmul.f32 %v497_v14, %v495_v60  ;;  %v505_v26 = vmul.f32 %v504_v21, %v495_v60  ;;  %v735_v48 = vshrl.u32 %v731_v3, 16  ;;  %v741_v32 = vadd.s32 %v739_v13, %v733_v49 }
 0x10d   : > { %v635_v30 = vor.u32 %v634_v6, %v633_v1  ;;  %v638_v2 = vshll.u32 %v637_v19, 23  ;;  %vm742_vm1 = vc.u32 %v740_v20, %v736_v7  ;;  %vm524_vm2 = vcmp.lt.s32.totalorder %v1627_v28, 0 }
 0x10e   : > { %v499_v16 = vadd.f32 -0.4999988, %v498_v24  ;;  %v506_v33 = vadd.f32 -0.16666654, %v505_v26  ;;  %v743_v9 = vsel %vm742_vm1, 1, %v1463_v15  ;;  %v758_v34 = vshll.u32 %v1885_v62, 16 }
 0x10f   : > { %vm1896_vm3 = vcmp.le.f32.partialorder %v522_v31, 0.7853982  ;;  %v639_v25 = vor.u32 4788187, %v638_v2  ;;  %v745_v36 = vadd.s32 %v743_v9, %v741_v32  ;;  %vm760_vm4 = vc.u32 %v752_v50, %v756_v22 }
 0x110   : > { %v762_v52 = vadd.s32 %v756_v22, %v752_v50  ;;  %v500_v38 = vmul.f32 %v499_v16, %v495_v60  ;;  %v507_v41 = vmul.f32 %v506_v33, %v495_v60  ;;  %vm513_vm5 = vcmp.lt.s32.totalorder %v1845_v47, 2 }
 0x111   : > { %v642_v54 = vcvt.s32.f32 %v635_v30  ;;  %v761_v3 = vsel %vm760_vm4, 1, %v1463_v15  ;;  %vm510_vm6 = vweird.f32 %v1625_v27  ;;  %v640_v44 = vand.u32 2147483647, %v639_v25 }
 0x112   : > { %v746_v37 = vadd.s32 %v745_v36, %v735_v48  ;;  %v763_v31 = vadd.s32 %v761_v3, %v755_v10  ;;  %vm764_vm7 = vc.u32 %v762_v52, %v758_v34  ;;  %v501_v51 = vadd.f32 1.0, %v500_v38 }
 0x113   : > { %v508_v42 = vadd.f32 1.0, %v507_v41  ;;  %v737_v49 = vshrl.u32 %v1879_v23, 16  ;;  %v765_v50 = vsel %vm764_vm7, 1, %v1463_v15  ;;  %v643_v60 = vmul.f32 %v642_v54, %v640_v44 }
 0x114   : > { %v757_v58 = vshrl.u32 %v1883_v45, 16  ;;  %v767_v43 = vadd.s32 %v765_v50, %v763_v31  ;;  %v351_v7 = vmul.f32 %v343_v39, %v335_v5  ;;  %v518_v21 = vxor.u32 2147483648, %v501_v51 }
 0x115   : > { %v509_v14 = vmul.f32 %v508_v42, %v1869_v56  ;;  %v1909_v1 = vadd.s32 %v746_v37, %v737_v49  ;;  %v358_v10 = vperm.slane %v1619_v18, 3  ;;  %vm514_vm8 = vcmp.eq.s32.totalorder %v1845_v47, 0 }
 0x116   : > { %v644_v6 = vxor.u32 2147483648, %v643_v60  ;;  %v759_v23 = vshrl.u32 %v1885_v62, 16  ;;  %v768_v19 = vadd.s32 %v767_v43, %v757_v58  ;;  %vm517_vm9 = vcmp.eq.s32.totalorder %v1845_v47, 2 }
 0x117   : > { %v515_v20 = vxor.u32 2147483648, %v509_v14  ;;  %v1916_v45 = vadd.s32 %v762_v52, %v758_v34  ;;  %v1918_v17 = vadd.f32 %v358_v10, %v351_v7  ;;  %v647_v18 = vsel %vm524_vm2, %v646_v46, %v1821_v0 }
 0x118   : > { %v645_v39 = vsel %vm524_vm2, %v644_v6, %v643_v60  ;;  %v716_v56 = vsel %vm710_vm13, %v1873_v11, %v1877_v12  ;;  %v769_v62 = vadd.s32 %v768_v19, %v759_v23  ;;  %v519_v24 = vsel %vm517_vm9, %v518_v21, %v509_v14 }
 0x119   : > { %v516_v22 = vsel %vm514_vm8, %v501_v51, %v515_v20  ;;  %v648_v26 = vsel %vm1896_vm3, %v1627_v28, %v645_v39  ;;  %vm772_vm10 = vc.u32 %v1909_v1, %v1916_v45  ;;  %v835_v46 = vand.u32 2139095040, %v1918_v17 }
 0x11a   : > { %v520_v30 = vsel %vm513_vm5, %v516_v22, %v519_v24  ;;  %v650_v13 = vmul.f32 %v648_v26, %v648_v26  ;;  %v773_v0 = vadd.s32 1, %v769_v62  ;;  %v770_v11 = vmul.u32 %v1823_v4, %v716_v56 }
 0x11b   : > { %v521_v29 = vsel %vm510_vm6, nan, %v520_v30  ;;  %v836_v32 = vshrl.u32 %v835_v46, 23  ;;  %v649_v47 = vsel %vm1896_vm3, 0, %v647_v18  ;;  %v832_v5 = vand.u32 2147483647, %v1918_v17 }
 0x11c   : > { %v651_v12 = vmul.f32 -0.001358992, %v650_v13  ;;  %v658_v2 = vmul.f32 -0.00019511016, %v650_v13  ;;  %v774_v48 = vsel %vm772_vm10, %v773_v0, %v769_v62  ;;  %987 = vst [vmem:[%s1942_s21] sm:$0xff] %v521_v29  ;;  %v666_v52 = vadd.s32 3, %v649_v47 }
 0x11d   : > { %v775_v16 = vadd.s32 %v774_v48, %v770_v11  ;;  %v1142_v34 = vadd.s32 4294967169, %v836_v32  ;;  %vm665_vm12 = vweird.f32 %v1627_v28  ;;  %v839_v43 = vand.u32 8388607, %v832_v5 }
 0x11e   : > { %v652_v33 = vadd.f32 0.041655596, %v651_v12  ;;  %v659_v9 = vadd.f32 0.008332121, %v658_v2  ;;  %v667_v31 = vand.u32 3, %v666_v52  ;;  %v771_v48 = vadd.s32 %v1916_v45, %v1909_v1 }
 0x11f   : > { %v776_v25 = vadd.s32 536870912, %v775_v16  ;;  %v842_v4 = vadd.s32 1, %v1142_v34  ;;  %v840_v56 = vor.u32 8388608, %v839_v43  ;;  %vm679_vm6 = vcmp.lt.s32.totalorder %v1645_v53, 0 }
 0x120   : > { %v653_v27 = vmul.f32 %v652_v33, %v650_v13  ;;  %v660_v36 = vmul.f32 %v659_v9, %v650_v13  ;;  %vm668_vm14 = vcmp.lt.s32.totalorder %v667_v31, 2  ;;  %vm669_vm15 = vcmp.eq.s32.totalorder %v667_v31, 0 }
 0x121   : > { %v1947_v38 = vshrl.u32 %v776_v25, 30  ;;  %vm843_vm11 = vcmp.gt.s32.totalorder %v842_v4, 0  ;;  %vm672_vm0 = vcmp.eq.s32.totalorder %v667_v31, 2  ;;  %vm2013_vm7 = vcmp.le.f32.partialorder %v677_v40, 0.7853982 }
 0x122   : > { %v654_v41 = vadd.f32 -0.4999988, %v653_v27  ;;  %v661_v54 = vadd.f32 -0.16666654, %v660_v36  ;;  %v844_v35 = vsel %vm843_vm11, %v842_v4, 0 }
 0x123   : > { %v778_v3 = vshll.u32 %v1947_v38, 30  ;;  %v846_v51 = vand.u32 31, %v844_v35  ;;  %v1962_v62 = vshrl.u32 %v844_v35, 5 }
 0x124   : > { %v655_v44 = vmul.f32 %v654_v41, %v650_v13  ;;  %v662_v37 = vmul.f32 %v661_v54, %v650_v13 }
 0x125   : > { %v779_v42 = vsub.s32 %v775_v16, %v778_v3  ;;  %v1951_v60 = vsub.s32 32, %v846_v51  ;;  %v849_v6 = vshll.u32 %v1457_v55, %v846_v51  ;;  %v852_v39 = vshll.u32 %v1458_v57, %v846_v51 }
 0x126   : > { %v656_v49 = vadd.f32 1.0, %v655_v44  ;;  %v663_v50 = vadd.f32 1.0, %v662_v37  ;;  %v855_v46 = vshll.u32 %v1459_v59, %v846_v51  ;;  %v861_v12 = vshll.u32 %v1461_v63, %v846_v51 }
 0x127   : > { %vm780_vm13 = vcmp.lt.s32.totalorder %v779_v42, 0  ;;  %v781_v58 = vsub.s32 0, %v779_v42  ;;  %v850_v21 = vshrl.u32 %v1458_v57, %v1951_v60  ;;  %v853_v23 = vshrl.u32 %v1459_v59, %v1951_v60 }
 0x128   : > { %v664_v7 = vmul.f32 %v663_v50, %v648_v26  ;;  %v673_v14 = vxor.u32 2147483648, %v656_v49  ;;  %v856_v13 = vshrl.u32 %v1460_v61, %v1951_v60  ;;  %v858_v57 = vshll.u32 %v1460_v61, %v846_v51 }
 0x129   : > { %v782_v10 = vsel %vm780_vm13, %v781_v58, %v779_v42  ;;  %v1964_v22 = vor.u32 %v850_v21, %v849_v6  ;;  %v1966_v30 = vor.u32 %v853_v23, %v852_v39  ;;  %v859_v29 = vshrl.u32 %v1461_v63, %v1951_v60 }
 0x12a   : > { %v670_v19 = vxor.u32 2147483648, %v664_v7  ;;  %v783_v20 = vclz %v782_v10  ;;  %v674_v18 = vsel %vm672_vm0, %v673_v14, %v664_v7  ;;  %v862_v2 = vshrl.u32 %v1462_v8, %v1951_v60 }
 0x12b   : > { %v857_v47 = vor.u32 %v856_v13, %v855_v46  ;;  %v860_v59 = vor.u32 %v859_v29, %v858_v57  ;;  %vm864_vm2 = vcmp.lt.s32.totalorder %v1962_v62, 1  ;;  %vm867_vm3 = vcmp.lt.s32.totalorder %v1962_v62, 4 }
 0x12c   : > { %v671_v24 = vsel %vm669_vm15, %v656_v49, %v670_v19  ;;  %v1140_v26 = vadd.s32 4294967294, %v783_v20  ;;  %v863_v33 = vor.u32 %v862_v2, %v861_v12  ;;  %v872_v63 = vsel %vm864_vm2, %v1964_v22, %v1966_v30 }
 0x12d   : > { %v675_v0 = vsel %vm668_vm14, %v671_v24, %v674_v18  ;;  %v1989_v8 = vshll.u32 %v840_v56, 8  ;;  %vm866_vm4 = vcmp.lt.s32.totalorder %v1962_v62, 3  ;;  %v873_v9 = vsel %vm867_vm3, %v860_v59, 920167782 }
 0x12e   : > { %v676_v11 = vsel %vm665_vm12, nan, %v675_v0  ;;  %vm1141_vm1 = vcmp.lt.s32.totalorder %v1140_v26, 0  ;;  %vm865_vm5 = vcmp.lt.s32.totalorder %v1962_v62, 2  ;;  %v874_v34 = vsel %vm866_vm4, %v857_v47, %v873_v9 }
 0x12f   : > { %v786_v32 = vsel %vm1141_vm1, 0, %v1140_v26  ;;  %988 = vst [vmem:[%s1942_s21 + $0x8] sm:$0xff] %v676_v11  ;;  %v876_v25 = vsel %vm864_vm2, %v1966_v30, %v857_v47  ;;  %v877_v27 = vsel %vm867_vm3, %v863_v33, 1326507024  ;;  %v875_v4 = vsel %vm865_vm5, %v872_v63, %v874_v34 }
 0x130   : > { %v787_v61 = vsub.s32 32, %v786_v32  ;;  %v791_v16 = vsub.s32 4294967266, %v786_v32  ;;  %v788_v28 = vshll.u32 %v779_v42, %v786_v32  ;;  %v878_v41 = vsel %vm866_vm4, %v860_v59, %v877_v27 }
 0x131   : > { %v881_v54 = vand.u32 65535, %v1989_v8  ;;  %v905_v3 = vand.u32 65535, %v875_v4  ;;  %v906_v35 = vshrl.u32 %v875_v4, 16  ;;  %v879_v37 = vsel %vm865_vm5, %v876_v25, %v878_v41 }
 0x132   : > { %v789_v1 = vshrl.u32 %v771_v48, %v787_v61  ;;  %v792_v45 = vadd.s32 127, %v791_v16  ;;  %v882_v31 = vshrl.u32 %v1989_v8, 16  ;;  %v883_v51 = vand.u32 65535, %v879_v37 }
 0x133   : > { %v884_v42 = vshrl.u32 %v879_v37, 16  ;;  %v908_v49 = vmul.u32 %v906_v35, %v881_v54  ;;  %v801_v14 = vsub.s32 4, %v1947_v38  ;;  %v848_v21 = vshrl.u32 %v1457_v55, %v1951_v60 }
 0x134   : > { %v790_v36 = vor.u32 %v789_v1, %v788_v28  ;;  %v793_v52 = vshll.u32 %v792_v45, 23  ;;  %v909_v7 = vmul.u32 %v905_v3, %v882_v31  ;;  %v887_v6 = vmul.u32 %v883_v51, %v882_v31 }
 0x135   : > { %v886_v10 = vmul.u32 %v884_v42, %v881_v54  ;;  %v869_v19 = vsel %vm867_vm3, %v857_v47, 2102212464  ;;  %v907_v20 = vmul.u32 %v905_v3, %v881_v54  ;;  %v911_v39 = vshll.u32 %v908_v49, 16 }
 0x136   : > { %v794_v44 = vor.u32 4788187, %v793_v52  ;;  %v797_v43 = vcvt.s32.f32 %v790_v36  ;;  %v885_v40 = vmul.u32 %v883_v51, %v881_v54  ;;  %v888_v18 = vmul.u32 %v884_v42, %v882_v31 }
 0x137   : > { %v889_v56 = vshll.u32 %v886_v10, 16  ;;  %v910_v24 = vmul.u32 %v906_v35, %v882_v31  ;;  %v913_v13 = vshll.u32 %v909_v7, 16  ;;  %vm915_vm8 = vc.u32 %v907_v20, %v911_v39 }
 0x138   : > { %v795_v58 = vand.u32 2147483647, %v794_v44  ;;  %v917_v0 = vadd.s32 %v911_v39, %v907_v20  ;;  %v891_v46 = vshll.u32 %v887_v6, 16  ;;  %v916_v55 = vsel %vm915_vm8, 1, %v1463_v15 }
 0x139   : > { %vm893_vm9 = vc.u32 %v885_v40, %v889_v56  ;;  %v895_v57 = vadd.s32 %v889_v56, %v885_v40  ;;  %v918_v11 = vadd.s32 %v916_v55, %v910_v24  ;;  %v912_v59 = vshrl.u32 %v908_v49, 16 }
 0x13a   : > { %v798_v23 = vmul.f32 %v797_v43, %v795_v58  ;;  %v894_v29 = vsel %vm893_vm9, 1, %v1463_v15  ;;  %vm919_vm10 = vc.u32 %v917_v0, %v913_v13  ;;  %v868_v16 = vsel %vm864_vm2, %v848_v21, %v1964_v22 }
 0x13b   : > { %v896_v2 = vadd.s32 %v894_v29, %v888_v18  ;;  %vm897_vm11 = vc.u32 %v895_v57, %v891_v46  ;;  %v920_v48 = vsel %vm919_vm10, 1, %v1463_v15  ;;  %v870_v33 = vsel %vm866_vm4, %v1966_v30, %v869_v19 }
 0x13c   : > { %v799_v26 = vxor.u32 2147483648, %v798_v23  ;;  %v898_v47 = vsel %vm897_vm11, 1, %v1463_v15  ;;  %v922_v61 = vadd.s32 %v920_v48, %v918_v11  ;;  %v890_v28 = vshrl.u32 %v886_v10, 16 }
 0x13d   : > { %v900_v63 = vadd.s32 %v898_v47, %v896_v2  ;;  %v914_v9 = vshrl.u32 %v909_v7, 16  ;;  %v802_v15 = vsel %vm679_vm6, %v801_v14, %v1947_v38  ;;  %v892_v25 = vshrl.u32 %v887_v6, 16 }
 0x13e   : > { %v800_v60 = vsel %vm679_vm6, %v799_v26, %v798_v23  ;;  %v923_v34 = vadd.s32 %v922_v61, %v912_v59  ;;  %v871_v22 = vsel %vm865_vm5, %v868_v16, %v870_v33  ;;  %v921_v30 = vadd.s32 %v917_v0, %v913_v13 }
 0x13f   : > { %v803_v12 = vsel %vm2013_vm7, %v1645_v53, %v800_v60  ;;  %v901_v27 = vadd.s32 %v900_v63, %v890_v28  ;;  %v804_v54 = vsel %vm2013_vm7, 0, %v802_v15  ;;  %v925_v37 = vmul.u32 %v1989_v8, %v871_v22 }
 0x140   : > { %v805_v32 = vmul.f32 %v803_v12, %v803_v12  ;;  %v924_v4 = vadd.s32 %v923_v34, %v914_v9  ;;  %v821_v42 = vadd.s32 3, %v804_v54  ;;  %vm820_vm0 = vweird.f32 %v1645_v53 }
 0x141   : > { %v902_v41 = vadd.s32 %v901_v27, %v892_v25  ;;  %vm834_vm3 = vcmp.lt.s32.totalorder %v1918_v17, 0  ;;  %vm2050_vm4 = vcmp.le.f32.partialorder %v832_v5, 0.7853982  ;;  %vm975_vm8 = vweird.f32 %v1918_v17 }
 0x142   : > { %v806_v1 = vmul.f32 -0.001358992, %v805_v32  ;;  %v813_v45 = vmul.f32 -0.00019511016, %v805_v32  ;;  %v928_v44 = vadd.s32 1, %v924_v4  ;;  %v822_v21 = vand.u32 3, %v821_v42 }
 0x143   : > { %vm927_vm12 = vc.u32 %v902_v41, %v921_v30  ;;  %v926_v46 = vadd.s32 %v921_v30, %v902_v41 }
 0x144   : > { %v807_v36 = vadd.f32 0.041655596, %v806_v1  ;;  %v814_v52 = vadd.f32 0.008332121, %v813_v45  ;;  %v929_v51 = vsel %vm927_vm12, %v928_v44, %v924_v4  ;;  %vm824_vm13 = vcmp.eq.s32.totalorder %v822_v21, 0 }
 0x145   : > { %v930_v49 = vadd.s32 %v929_v51, %v925_v37  ;;  %vm827_vm14 = vcmp.eq.s32.totalorder %v822_v21, 2  ;;  %vm823_vm15 = vcmp.lt.s32.totalorder %v822_v21, 2 }
 0x146   : > { %v808_v3 = vmul.f32 %v807_v36, %v805_v32  ;;  %v815_v35 = vmul.f32 %v814_v52, %v805_v32 }
 0x147   : > { %v931_v43 = vadd.s32 536870912, %v930_v49 }
 0x148   : > { %v809_v38 = vadd.f32 -0.4999988, %v808_v3  ;;  %v816_v31 = vadd.f32 -0.16666654, %v815_v35 }
 0x149   : > { %v932_v10 = vshrl.u32 %v931_v43, 30 }
 0x14a   : > { %v810_v58 = vmul.f32 %v809_v38, %v805_v32  ;;  %v817_v62 = vmul.f32 %v816_v31, %v805_v32 }
 0x14b   : > { %v933_v23 = vshll.u32 %v932_v10, 30  ;;  %v956_v33 = vsub.s32 4, %v932_v10 }
 0x14c   : > { %v811_v7 = vadd.f32 1.0, %v810_v58  ;;  %v818_v14 = vadd.f32 1.0, %v817_v62 }
 0x14d   : > { %v934_v8 = vsub.s32 %v930_v49, %v933_v23  ;;  %v957_v9 = vsel %vm834_vm3, %v956_v33, %v932_v10 }
 0x14e   : > { %v819_v50 = vmul.f32 %v818_v14, %v803_v12  ;;  %v828_v6 = vxor.u32 2147483648, %v811_v7  ;;  %v959_v5 = vsel %vm2050_vm4, 0, %v957_v9 }
 0x14f   : > { %vm935_vm1 = vcmp.lt.s32.totalorder %v934_v8, 0  ;;  %v936_v18 = vsub.s32 0, %v934_v8  ;;  %v976_v22 = vadd.s32 3, %v959_v5 }
 0x150   : > { %v825_v19 = vxor.u32 2147483648, %v819_v50  ;;  %v829_v39 = vsel %vm827_vm14, %v828_v6, %v819_v50 }
 0x151   : > { %v937_v24 = vsel %vm935_vm1, %v936_v18, %v934_v8  ;;  %v977_v3 = vand.u32 3, %v976_v22 }
 0x152   : > { %v826_v20 = vsel %vm824_vm13, %v811_v7, %v825_v19  ;;  %v938_v26 = vclz %v937_v24 }
 0x153   : > { %v830_v40 = vsel %vm823_vm15, %v826_v20, %v829_v39  ;;  %vm979_vm5 = vcmp.eq.s32.totalorder %v977_v3, 0  ;;  %vm982_vm6 = vcmp.eq.s32.totalorder %v977_v3, 2  ;;  %vm978_vm7 = vcmp.lt.s32.totalorder %v977_v3, 2 }
 0x154   : > { %v831_v56 = vsel %vm820_vm0, nan, %v830_v40  ;;  %v1143_v13 = vadd.s32 4294967294, %v938_v26 }
 0x155   : > { %989 = vst [vmem:[%s1942_s21 + $0x10] sm:$0xff] %v831_v56 }
 0x156   : > { %vm1144_vm2 = vcmp.lt.s32.totalorder %v1143_v13, 0 }
 0x157   : > { %v941_v0 = vsel %vm1144_vm2, 0, %v1143_v13 }
 0x158   : > { %v942_v57 = vsub.s32 32, %v941_v0  ;;  %v946_v55 = vsub.s32 4294967266, %v941_v0  ;;  %v943_v60 = vshll.u32 %v934_v8, %v941_v0 }
 0x15a   : > { %v944_v29 = vshrl.u32 %v926_v46, %v942_v57  ;;  %v947_v11 = vadd.s32 127, %v946_v55 }
 0x15c   : > { %v945_v12 = vor.u32 %v944_v29, %v943_v60  ;;  %v948_v2 = vshll.u32 %v947_v11, 23 }
 0x15e   : > { %v949_v48 = vor.u32 4788187, %v948_v2  ;;  %v952_v32 = vcvt.s32.f32 %v945_v12 }
 0x160   : > { %v950_v53 = vand.u32 2147483647, %v949_v48 }
 0x162   : > { %v953_v47 = vmul.f32 %v952_v32, %v950_v53 }
 0x164   : > { %v954_v59 = vxor.u32 2147483648, %v953_v47 }
 0x166   : > { %v955_v16 = vsel %vm834_vm3, %v954_v59, %v953_v47 }
 0x167   : > { %v958_v28 = vsel %vm2050_vm4, %v1918_v17, %v955_v16 }
 0x168   : > { %v960_v63 = vmul.f32 %v958_v28, %v958_v28 }
 0x16a   : > { %v961_v1 = vmul.f32 -0.001358992, %v960_v63  ;;  %v968_v45 = vmul.f32 -0.00019511016, %v960_v63 }
 0x16c   : > { %v962_v34 = vadd.f32 0.041655596, %v961_v1  ;;  %v969_v15 = vadd.f32 0.008332121, %v968_v45 }
 0x16e   : > { %v963_v25 = vmul.f32 %v962_v34, %v960_v63  ;;  %v970_v27 = vmul.f32 %v969_v15, %v960_v63 }
 0x170   : > { %v964_v36 = vadd.f32 -0.4999988, %v963_v25  ;;  %v971_v52 = vadd.f32 -0.16666654, %v970_v27 }
 0x172   : > { %v965_v4 = vmul.f32 %v964_v36, %v960_v63  ;;  %v972_v41 = vmul.f32 %v971_v52, %v960_v63 }
 0x174   : > { %v966_v30 = vadd.f32 1.0, %v965_v4  ;;  %v973_v54 = vadd.f32 1.0, %v972_v41 }
 0x176   : > { %v974_v35 = vmul.f32 %v973_v54, %v958_v28  ;;  %v983_v44 = vxor.u32 2147483648, %v966_v30 }
 0x178   : > { %v980_v37 = vxor.u32 2147483648, %v974_v35  ;;  %v984_v31 = vsel %vm982_vm6, %v983_v44, %v974_v35 }
 0x17a   : > { %v981_v38 = vsel %vm979_vm5, %v966_v30, %v980_v37 }
 0x17b   : > { %v985_v51 = vsel %vm978_vm7, %v981_v38, %v984_v31 }
 0x17c   : > { %v986_v42 = vsel %vm975_vm8, nan, %v985_v51 }
 0x17d   : > { %990 = vst [vmem:[%s1942_s21 + $0x18] sm:$0xff] %v986_v42 }
 0x17e   : > { %1376 = shalt.err (!%p1373_p12)
}
 0x17f   : > { %1161 = dma.vmem_to_hbm [thread:$0]  (%p1575_p0), %s1008_s16, 512, %s1010_s5, %s992_s6  }
 0x180 PF: > { %p1183_p13 = scmp.ge.s32.totalorder %s1451_s19, 2  ;;  %s1021_s11 = sand.u32 1, %s1423_s12  }
 0x181   : > { %s1022_s2 = scalar_lea.sflag [#allocation4], %s1021_s11 }
 0x182   : > { %p1175_p2 = pnand %p1183_p13, %p1582_p6 }
 0x184   : > { %p1176_p4 = pneg %p1175_p2 }
 0x186   : > { %1418 = dma.done.wait (%p1176_p4), %s1022_s2, 512  }
 0x187   : > { %1420 = vsyncadd (%p1176_p4), %s1022_s2, 4294966784  ;;  %s20_s19 = sadd.s32 1, %s1451_s19   ;;  %s2132_s26 = sld [smem:[#allocation12_spill]] }
 0x188   : > { %p17_p5 = scmp.ge.s32.totalorder %s20_s19, 6   ;;  %s2133_s21 = sld [smem:[#allocation13_spill]] }
 0x189   : > { %s2134_s12 = smov %s1427_s13  ;;  %s2135_s13 = smov %s1431_s14 }
 0x18a   : > { %s2136_s14 = smov %s1589_s4  ;;  %s2137_s15 = smov %s1443_s17 }
 0x18b   : > { %s2138_s16 = smov %s1447_s18  ;;  %19 = sbr.rel (!%p17_p5) target bundleno = 11 (0xb), region = 86 }
 0x18d   : > { %s2139_s17 = smov %s2132_s26 }
 0x18e   : > { %s2140_s18 = smov %s2133_s21 }
 0x190   :  { %1028 = vsyncpa [#allocation3], 1 }
 0x191   :  { %1030 = vsyncpa [#allocation3 + $0x1], 1 }
 0x192   :  { %1031 = vsyncpa [#allocation6], 1 }
 0x193   :  { %1032 = vsyncpa [#allocation4], 1 }
 0x194   :  { %1034 = vsyncpa [#allocation4 + $0x1], 1 }

</bundles_post_ra>
